<compile_context>
chip_gen: v5e
topology: v5e:2x2
jax: 0.10.0
libtpu: 0.0.40
codegen_flags: <defaults>
</compile_context>

<pallas_src>
import functools

import jax
import jax.numpy as jnp
from jax.experimental import pallas as pl
from jax.experimental.pallas import tpu as pltpu


# ---------------------------------------------------------------------------
# Kernel: one HeteroGraphConv direction (+ folded fc head), tiled over dst rows
# ---------------------------------------------------------------------------
def _direction_kernel(xc_ref, wc_ref, a_ref, ci_ref, b_ref, out_ref, acc_ref, *, reverse):
    r = pl.program_id(1)

    @pl.when(r == 0)
    def _init():
        acc_ref[...] = jnp.zeros_like(acc_ref)

    # per-rating composite projection of the resident, cj-scaled source features
    p = jnp.dot(xc_ref[...], wc_ref[0], preferred_element_type=jnp.float32)  # (Nsrc, Opad)

    a = a_ref[0].astype(jnp.float32)  # bf16 0/1 adjacency tile -> exact f32 for the MXU
    if reverse:
        # A tile is (Nsrc, tile_dst): contract over the src axis  ==  A_r^T @ p
        contrib = jax.lax.dot_general(a, p, (((0,), (0,)), ((), ())),
                                      preferred_element_type=jnp.float32)
    else:
        # A tile is (tile_dst, Nsrc)
        contrib = jnp.dot(a, p, preferred_element_type=jnp.float32)
    acc_ref[...] += contrib

    @pl.when(r == pl.num_programs(1) - 1)
    def _finalize():
        # ci row-scaling commuted past the folded head; bias comes from the fc layer.
        # agg_act / dropout(0) / out_act are identity under the module defaults.
        out_ref[...] = (acc_ref[...] * ci_ref[...] + b_ref[...]).astype(out_ref.dtype)


def _gcmc_direction(xc, wcomp, a, ci, bias, *, reverse, tile_dst):
    """One direction: out[dst] = ci * sum_r A_r(^T) @ (xc @ wcomp[r]) + bias."""
    R, fin, opad = wcomp.shape
    nsrc_pad = xc.shape[0]
    ndst_pad = a.shape[2] if reverse else a.shape[1]
    assert ndst_pad % tile_dst == 0
    n_tiles = ndst_pad // tile_dst

    if reverse:
        # dst (user) axis is the lane axis of the A tile -> tile_dst must be a
        # multiple of 128 or the full extent (full here at toy scale).
        a_spec = pl.BlockSpec((1, a.shape[1], tile_dst), lambda i, r: (r, 0, i))
    else:
        a_spec = pl.BlockSpec((1, tile_dst, a.shape[2]), lambda i, r: (r, i, 0))

    flops = 2 * R * (n_tiles * nsrc_pad * fin * opad + ndst_pad * nsrc_pad * opad)
    bytes_accessed = (4 * (xc.size + wcomp.size + ci.size + bias.size + ndst_pad * opad)
                      + 2 * a.size)  # adjacency is bf16

    kernel = functools.partial(_direction_kernel, reverse=reverse)
    return pl.pallas_call(
        kernel,
        out_shape=jax.ShapeDtypeStruct((ndst_pad, opad), jnp.float32),
        grid_spec=pltpu.PrefetchScalarGridSpec(
            num_scalar_prefetch=0,
            grid=(n_tiles, R),                              # reduction (rating) axis last
            in_specs=[
                pl.BlockSpec((nsrc_pad, fin), lambda i, r: (0, 0)),    # resident src feats
                pl.BlockSpec((1, fin, opad), lambda i, r: (r, 0, 0)),  # per-rating weight
                a_spec,                                                # streamed A tile (bf16)
                pl.BlockSpec((tile_dst, 1), lambda i, r: (i, 0)),      # ci for this dst tile
                pl.BlockSpec((1, opad), lambda i, r: (0, 0)),          # folded-head bias
            ],
            out_specs=pl.BlockSpec((tile_dst, opad), lambda i, r: (i, 0)),
            scratch_shapes=[pltpu.VMEM((tile_dst, opad), jnp.float32)],
        ),
        compiler_params=pltpu.CompilerParams(
            dimension_semantics=("parallel", "arbitrary"),
            vmem_limit_bytes=32 * 1024 * 1024,  # safe on all of v5e/v6e/v7x at these tiles
        ),
        cost_estimate=pl.CostEstimate(flops=int(flops), transcendentals=0,
                                      bytes_accessed=int(bytes_accessed)),
    )(xc, wcomp, a, ci, bias)


# ---------------------------------------------------------------------------
# Layer forward (two directions share the single adjacency operand)
# ---------------------------------------------------------------------------
def gcmc_layer_forward(kparams, pgraph, ufeat, ifeat):
    Nu, Nm = pgraph["Nu"], pgraph["Nm"]
    Nu_pad, Nm_pad = pgraph["Nu_pad"], pgraph["Nm_pad"]
    out_units = kparams["out_units"]

    # cj scaling hoisted once per direction; zero-padded rows contribute nothing.
    xc_u = jnp.zeros((Nu_pad, ufeat.shape[1]), jnp.float32).at[:Nu].set(ufeat) * pgraph["cj_user"]
    xc_m = jnp.zeros((Nm_pad, ifeat.shape[1]), jnp.float32).at[:Nm].set(ifeat) * pgraph["cj_movie"]

    # etype 'r'    : user -> movie (dst = movie), standard orientation of A
    i_out = _gcmc_direction(xc_u, kparams["Wc_movie"], pgraph["A"], pgraph["ci_movie"],
                            kparams["ifc_b"], reverse=False,
                            tile_dst=pgraph["tile_dst_movie"])
    # etype 'rev-r': movie -> user (dst = user), SAME A tiles contracted over the dst axis
    u_out = _gcmc_direction(xc_m, kparams["Wc_user"], pgraph["A"], pgraph["ci_user"],
                            kparams["ufc_b"], reverse=True,
                            tile_dst=Nu_pad)

    # drop padding rows / padded output lanes (lane-dense inside the kernel)
    return u_out[:Nu, :out_units], i_out[:Nm, :out_units]


# ---------------------------------------------------------------------------
# One-time (outside jit) parameter / graph re-layout
# ---------------------------------------------------------------------------
def _round_up(x, m):
    return ((x + m - 1) // m) * m


def prepare_kernel_params(params, out_pad=128):
    """Fold the fc heads into the per-rating conv weights; pad head dim to 128 lanes.

    Exact only because dropout_rate=0 and agg_act/out_act are identity (module
    defaults).
    TODO(synk): with a non-identity agg_act the head must stay a separate in-kernel
    matmul applied after the activation instead of being folded here.
    """
    W_user, W_movie = params["W_user"], params["W_movie"]          # (R, Fin, msg_r)
    R, _, msg_r = W_user.shape
    out_units = params["ufc_w"].shape[0]

    # torch Linear: out = x @ W.T + b ; row-block r of W.T is the head block for rating r.
    ufc_blocks = params["ufc_w"].T.reshape(R, msg_r, out_units)
    ifc_blocks = params["ifc_w"].T.reshape(R, msg_r, out_units)

    wc_movie = jnp.einsum("rfm,rmo->rfo", W_user, ifc_blocks)      # movie-dst direction
    wc_user = jnp.einsum("rfm,rmo->rfo", W_movie, ufc_blocks)      # user-dst direction

    def pad_out(w):
        return jnp.zeros(w.shape[:-1] + (out_pad,), jnp.float32).at[..., :out_units].set(w)

    def pad_bias(b):
        return jnp.zeros((1, out_pad), jnp.float32).at[0, :out_units].set(b)

    return dict(out_units=out_units,
                Wc_movie=pad_out(wc_movie), Wc_user=pad_out(wc_user),
                ifc_b=pad_bias(params["ifc_b"]), ufc_b=pad_bias(params["ufc_b"]))


def prepare_graph(A, cj_user, ci_user, cj_movie, ci_movie, *, tile_dst_movie=8):
    """Pad node dims to tile multiples; store the single adjacency copy as bf16."""
    R, Nm, Nu = A.shape
    Nm_pad = _round_up(Nm, tile_dst_movie)
    Nu_pad = _round_up(Nu, 8)
    A_pad = jnp.zeros((R, Nm_pad, Nu_pad), jnp.bfloat16).at[:, :Nm, :Nu].set(
        A.astype(jnp.bfloat16))                                    # 0/1 -> exact in bf16

    def padcol(v, n):
        return jnp.zeros((n, 1), jnp.float32).at[:v.shape[0], :].set(v)

    return dict(A=A_pad,
                cj_user=padcol(cj_user, Nu_pad), ci_user=padcol(ci_user, Nu_pad),
                cj_movie=padcol(cj_movie, Nm_pad), ci_movie=padcol(ci_movie, Nm_pad),
                Nu=Nu, Nm=Nm, Nu_pad=Nu_pad, Nm_pad=Nm_pad,
                tile_dst_movie=tile_dst_movie)


# ---------------------------------------------------------------------------
# Pure-JAX reference (original torch semantics, for correctness check)
# ---------------------------------------------------------------------------
def ref_forward(params, graph, ufeat, ifeat):
    R = params["W_user"].shape[0]
    movie_list, user_list = [], []
    for r in range(R):
        h = (ufeat @ params["W_user"][r]) * graph["cj_user"]
        movie_list.append((graph["A"][r] @ h) * graph["ci_movie"])
        g = (ifeat @ params["W_movie"][r]) * graph["cj_movie"]
        user_list.append((graph["A"][r].T @ g) * graph["ci_user"])
    ifeat_agg = jnp.stack(movie_list, axis=1).reshape(ifeat.shape[0], -1)
    ufeat_agg = jnp.stack(user_list, axis=1).reshape(ufeat.shape[0], -1)
    u_out = ufeat_agg @ params["ufc_w"].T + params["ufc_b"]
    i_out = ifeat_agg @ params["ifc_w"].T + params["ifc_b"]
    return u_out, i_out


def xavier_uniform(key, shape):
    fan_in, fan_out = shape[-2], shape[-1]
    bound = jnp.sqrt(6.0 / (fan_in + fan_out))
    return jax.random.uniform(key, shape, jnp.float32, -bound, bound)


if __name__ == "__main__":
    # small synthetic shapes consistent with GCMCLayer(__init__)
    rating_vals = [1, 2, 3, 4]          # R = 4
    R = len(rating_vals)
    user_in_units = 16
    movie_in_units = 24
    msg_units = 32                      # agg='stack' -> per-rating msg = 32 // 4 = 8
    out_units = 16
    msg_r = msg_units // R
    Nu, Nm = 12, 10

    key = jax.random.PRNGKey(0)
    keys = jax.random.split(key, 10)

    # GCMCGraphConv weights (one per etype; share_user_item_param=False path)
    W_user = xavier_uniform(keys[0], (R, user_in_units, msg_r))     # etype 'r'
    W_movie = xavier_uniform(keys[1], (R, movie_in_units, msg_r))   # etype 'rev-r'
    # ufc / ifc Linear(msg_units, out_units): torch layout (out, in)
    ufc_w = xavier_uniform(keys[2], (out_units, msg_units))
    ufc_b = jnp.zeros((out_units,), jnp.float32)
    ifc_w = xavier_uniform(keys[3], (out_units, msg_units))
    ifc_b = jnp.zeros((out_units,), jnp.float32)
    params = dict(W_user=W_user, W_movie=W_movie,
                  ufc_w=ufc_w, ufc_b=ufc_b, ifc_w=ifc_w, ifc_b=ifc_b)

    # synthetic bipartite rating graph: dense per-rating adjacency A[r]: (Nm, Nu)
    A = (jax.random.uniform(keys[4], (R, Nm, Nu)) < 0.3).astype(jnp.float32)
    # GCMC-style symmetric degree norms ci/cj (graph node data)
    deg_user = jnp.sum(A, axis=(0, 1))                               # (Nu,)
    deg_movie = jnp.sum(A, axis=(0, 2))                              # (Nm,)
    cj_user = (1.0 / jnp.sqrt(1.0 + deg_user)).reshape(Nu, 1)
    ci_user = cj_user
    cj_movie = (1.0 / jnp.sqrt(1.0 + deg_movie)).reshape(Nm, 1)
    ci_movie = cj_movie
    graph = dict(A=A, cj_user=cj_user, ci_user=ci_user,
                 cj_movie=cj_movie, ci_movie=ci_movie)

    # node input features
    ufeat = jax.random.normal(keys[5], (Nu, user_in_units), jnp.float32)
    ifeat = jax.random.normal(keys[6], (Nm, movie_in_units), jnp.float32)

    # one-time layout preprocessing (outside jit), then tiled forward
    kparams = prepare_kernel_params(params)
    pgraph = prepare_graph(A, cj_user, ci_user, cj_movie, ci_movie, tile_dst_movie=8)
    fwd = jax.jit(functools.partial(gcmc_layer_forward, kparams, pgraph))
    u_out, i_out = fwd(ufeat, ifeat)
    jax.block_until_ready((u_out, i_out))

    # correctness vs pure-JAX reference
    u_ref, i_ref = ref_forward(params, graph, ufeat, ifeat)
    assert u_out.shape == (Nu, out_units) and i_out.shape == (Nm, out_units)
    assert jnp.allclose(u_out, u_ref, atol=1e-4, rtol=1e-4)
    assert jnp.allclose(i_out, i_ref, atol=1e-4, rtol=1e-4)

    print("KERNEL_OK")
</pallas_src>

<mosaic_0001>
module attributes {stable_mosaic.version = 11 : i64} {
  func.func @_direction_kernel(%arg0: i32, %arg1: i32, %arg2: memref<16x16xf32, #tpu.memory_space<vmem>>, %arg3: memref<1x16x128xf32, #tpu.memory_space<vmem>>, %arg4: memref<1x8x16xbf16, #tpu.memory_space<vmem>>, %arg5: memref<8x1xf32, #tpu.memory_space<vmem>>, %arg6: memref<1x128xf32, #tpu.memory_space<vmem>>, %arg7: memref<8x128xf32, #tpu.memory_space<vmem>>, %arg8: memref<8x128xf32, #tpu.memory_space<vmem>>) attributes {dimension_semantics = [#tpu.dimension_semantics<parallel>, #tpu.dimension_semantics<arbitrary>], iteration_bounds = array<i64: 2, 4>, scalar_prefetch = 0 : i64, scratch_operands = 1 : i64, tpu.core_type = #tpu.core_type<tc>, window_params = [{pipeline_mode = #tpu.pipeline_mode<synchronous>, transform_indices = @transform_0, window_bounds = array<i64: 16, 16>}, {transform_indices = @transform_1, window_bounds = array<i64: 1, 16, 128>}, {transform_indices = @transform_2, window_bounds = array<i64: 1, 8, 16>}, {transform_indices = @transform_3, window_bounds = array<i64: 8, 1>}, {pipeline_mode = #tpu.pipeline_mode<synchronous>, transform_indices = @transform_4, window_bounds = array<i64: 1, 128>}, {transform_indices = @transform_5, window_bounds = array<i64: 8, 128>}]} {
    %c0_i32 = arith.constant 0 : i32
    %0 = arith.cmpi eq, %arg1, %c0_i32 : i32
    %1 = arith.extui %0 : i1 to i32
    %c0_i32_0 = arith.constant 0 : i32
    %2 = arith.cmpi ne, %1, %c0_i32_0 : i32
    scf.if %2 {
      %cst_14 = arith.constant 0.000000e+00 : f32
      %17 = vector.broadcast %cst_14 : f32 to vector<8x128xf32>
      %c0_15 = arith.constant 0 : index
      %c0_16 = arith.constant 0 : index
      %18 = vector.load %arg8[%c0_15, %c0_16] : memref<8x128xf32, #tpu.memory_space<vmem>>, vector<8x128xf32>
      tpu.vector_store %arg8[%c0_15, %c0_16], %17 {strides = array<i32>} : memref<8x128xf32, #tpu.memory_space<vmem>>, vector<8x128xf32>,
    } else {
    }
    %c0 = arith.constant 0 : index
    %c0_1 = arith.constant 0 : index
    %3 = vector.load %arg2[%c0, %c0_1] : memref<16x16xf32, #tpu.memory_space<vmem>>, vector<16x16xf32>
    %c0_2 = arith.constant 0 : index
    %c0_3 = arith.constant 0 : index
    %c0_4 = arith.constant 0 : index
    %4 = vector.load %arg3[%c0_2, %c0_3, %c0_4] : memref<1x16x128xf32, #tpu.memory_space<vmem>>, vector<1x16x128xf32>
    %5 = vector.shape_cast %4 : vector<1x16x128xf32> to vector<16x128xf32>
    %cst = arith.constant dense<0.000000e+00> : vector<16x128xf32>
    %6 = tpu.matmul %3, %5, %cst {dimension_numbers = #tpu.dot_dimension_numbers<[1], [0], [0], [1], [0, 0, 1, 1], [], []>} : vector<16x16xf32>, vector<16x128xf32>, vector<16x128xf32> -> vector<16x128xf32>
    %c0_5 = arith.constant 0 : index
    %c0_6 = arith.constant 0 : index
    %c0_7 = arith.constant 0 : index
    %7 = vector.load %arg4[%c0_5, %c0_6, %c0_7] : memref<1x8x16xbf16, #tpu.memory_space<vmem>>, vector<1x8x16xbf16>
    %8 = vector.shape_cast %7 : vector<1x8x16xbf16> to vector<8x16xbf16>
    %9 = arith.extf %8 : vector<8x16xbf16> to vector<8x16xf32>
    %cst_8 = arith.constant dense<0.000000e+00> : vector<8x128xf32>
    %10 = tpu.matmul %9, %6, %cst_8 {dimension_numbers = #tpu.dot_dimension_numbers<[1], [0], [0], [1], [0, 0, 1, 1], [], []>} : vector<8x16xf32>, vector<16x128xf32>, vector<8x128xf32> -> vector<8x128xf32>
    %c0_9 = arith.constant 0 : index
    %c0_10 = arith.constant 0 : index
    %11 = vector.load %arg8[%c0_9, %c0_10] : memref<8x128xf32, #tpu.memory_space<vmem>>, vector<8x128xf32>
    %12 = arith.addf %11, %10 : vector<8x128xf32>
    %c0_11 = arith.constant 0 : index
    %c0_12 = arith.constant 0 : index
    %13 = vector.load %arg8[%c0_11, %c0_12] : memref<8x128xf32, #tpu.memory_space<vmem>>, vector<8x128xf32>
    tpu.vector_store %arg8[%c0_11, %c0_12], %12 {strides = array<i32>} : memref<8x128xf32, #tpu.memory_space<vmem>>, vector<8x128xf32>,
    %c3_i32 = arith.constant 3 : i32
    %14 = arith.cmpi eq, %arg1, %c3_i32 : i32
    %15 = arith.extui %14 : i1 to i32
    %c0_i32_13 = arith.constant 0 : i32
    %16 = arith.cmpi ne, %15, %c0_i32_13 : i32
    scf.if %16 {
      %c0_14 = arith.constant 0 : index
      %c0_15 = arith.constant 0 : index
      %17 = vector.load %arg8[%c0_14, %c0_15] : memref<8x128xf32, #tpu.memory_space<vmem>>, vector<8x128xf32>
      %c0_16 = arith.constant 0 : index
      %c0_17 = arith.constant 0 : index
      %18 = vector.load %arg5[%c0_16, %c0_17] : memref<8x1xf32, #tpu.memory_space<vmem>>, vector<8x1xf32>
      %19 = vector.broadcast %18 : vector<8x1xf32> to vector<8x128xf32>
      %20 = arith.mulf %17, %19 : vector<8x128xf32>
      %c0_18 = arith.constant 0 : index
      %c0_19 = arith.constant 0 : index
      %21 = vector.load %arg6[%c0_18, %c0_19] : memref<1x128xf32, #tpu.memory_space<vmem>>, vector<1x128xf32>
      %22 = vector.broadcast %21 : vector<1x128xf32> to vector<8x128xf32>
      %23 = arith.addf %20, %22 : vector<8x128xf32>
      %c0_20 = arith.constant 0 : index
      %c0_21 = arith.constant 0 : index
      %24 = vector.load %arg7[%c0_20, %c0_21] : memref<8x128xf32, #tpu.memory_space<vmem>>, vector<8x128xf32>
      tpu.vector_store %arg7[%c0_20, %c0_21], %23 {strides = array<i32>} : memref<8x128xf32, #tpu.memory_space<vmem>>, vector<8x128xf32>,
    } else {
    }
    return
  }
  func.func @transform_0(%arg0: i32, %arg1: i32) -> (i32, i32) {
    %c0_i32 = arith.constant 0 : i32
    %c0_i32_0 = arith.constant 0 : i32
    %c0_i32_1 = arith.constant 0 : i32
    return %c0_i32, %c0_i32_0 : i32, i32
  }
  func.func @transform_1(%arg0: i32, %arg1: i32) -> (i32, i32, i32) {
    %c0_i32 = arith.constant 0 : i32
    %c0_i32_0 = arith.constant 0 : i32
    %c0_i32_1 = arith.constant 0 : i32
    return %arg1, %c0_i32, %c0_i32_0 : i32, i32, i32
  }
  func.func @transform_2(%arg0: i32, %arg1: i32) -> (i32, i32, i32) {
    %c0_i32 = arith.constant 0 : i32
    %c0_i32_0 = arith.constant 0 : i32
    return %arg1, %arg0, %c0_i32 : i32, i32, i32
  }
  func.func @transform_3(%arg0: i32, %arg1: i32) -> (i32, i32) {
    %c0_i32 = arith.constant 0 : i32
    %c0_i32_0 = arith.constant 0 : i32
    return %arg0, %c0_i32 : i32, i32
  }
  func.func @transform_4(%arg0: i32, %arg1: i32) -> (i32, i32) {
    %c0_i32 = arith.constant 0 : i32
    %c0_i32_0 = arith.constant 0 : i32
    %c0_i32_1 = arith.constant 0 : i32
    return %c0_i32, %c0_i32_0 : i32, i32
  }
  func.func @transform_5(%arg0: i32, %arg1: i32) -> (i32, i32) {
    %c0_i32 = arith.constant 0 : i32
    %c0_i32_0 = arith.constant 0 : i32
    return %arg0, %c0_i32 : i32, i32
  }
}

module attributes {stable_mosaic.version = 11 : i64} {
  func.func @_direction_kernel(%arg0: i32, %arg1: i32, %arg2: memref<16x24xf32, #tpu.memory_space<vmem>>, %arg3: memref<1x24x128xf32, #tpu.memory_space<vmem>>, %arg4: memref<1x16x16xbf16, #tpu.memory_space<vmem>>, %arg5: memref<16x1xf32, #tpu.memory_space<vmem>>, %arg6: memref<1x128xf32, #tpu.memory_space<vmem>>, %arg7: memref<16x128xf32, #tpu.memory_space<vmem>>, %arg8: memref<16x128xf32, #tpu.memory_space<vmem>>) attributes {dimension_semantics = [#tpu.dimension_semantics<parallel>, #tpu.dimension_semantics<arbitrary>], iteration_bounds = array<i64: 1, 4>, scalar_prefetch = 0 : i64, scratch_operands = 1 : i64, tpu.core_type = #tpu.core_type<tc>, window_params = [{pipeline_mode = #tpu.pipeline_mode<synchronous>, transform_indices = @transform_0, window_bounds = array<i64: 16, 24>}, {transform_indices = @transform_1, window_bounds = array<i64: 1, 24, 128>}, {transform_indices = @transform_2, window_bounds = array<i64: 1, 16, 16>}, {transform_indices = @transform_3, window_bounds = array<i64: 16, 1>}, {pipeline_mode = #tpu.pipeline_mode<synchronous>, transform_indices = @transform_4, window_bounds = array<i64: 1, 128>}, {transform_indices = @transform_5, window_bounds = array<i64: 16, 128>}]} {
    %c0_i32 = arith.constant 0 : i32
    %0 = arith.cmpi eq, %arg1, %c0_i32 : i32
    %1 = arith.extui %0 : i1 to i32
    %c0_i32_0 = arith.constant 0 : i32
    %2 = arith.cmpi ne, %1, %c0_i32_0 : i32
    scf.if %2 {
      %cst_14 = arith.constant 0.000000e+00 : f32
      %17 = vector.broadcast %cst_14 : f32 to vector<16x128xf32>
      %c0_15 = arith.constant 0 : index
      %c0_16 = arith.constant 0 : index
      %18 = vector.load %arg8[%c0_15, %c0_16] : memref<16x128xf32, #tpu.memory_space<vmem>>, vector<16x128xf32>
      tpu.vector_store %arg8[%c0_15, %c0_16], %17 {strides = array<i32>} : memref<16x128xf32, #tpu.memory_space<vmem>>, vector<16x128xf32>,
    } else {
    }
    %c0 = arith.constant 0 : index
    %c0_1 = arith.constant 0 : index
    %3 = vector.load %arg2[%c0, %c0_1] : memref<16x24xf32, #tpu.memory_space<vmem>>, vector<16x24xf32>
    %c0_2 = arith.constant 0 : index
    %c0_3 = arith.constant 0 : index
    %c0_4 = arith.constant 0 : index
    %4 = vector.load %arg3[%c0_2, %c0_3, %c0_4] : memref<1x24x128xf32, #tpu.memory_space<vmem>>, vector<1x24x128xf32>
    %5 = vector.shape_cast %4 : vector<1x24x128xf32> to vector<24x128xf32>
    %cst = arith.constant dense<0.000000e+00> : vector<16x128xf32>
    %6 = tpu.matmul %3, %5, %cst {dimension_numbers = #tpu.dot_dimension_numbers<[1], [0], [0], [1], [0, 0, 1, 1], [], []>} : vector<16x24xf32>, vector<24x128xf32>, vector<16x128xf32> -> vector<16x128xf32>
    %c0_5 = arith.constant 0 : index
    %c0_6 = arith.constant 0 : index
    %c0_7 = arith.constant 0 : index
    %7 = vector.load %arg4[%c0_5, %c0_6, %c0_7] : memref<1x16x16xbf16, #tpu.memory_space<vmem>>, vector<1x16x16xbf16>
    %8 = vector.shape_cast %7 : vector<1x16x16xbf16> to vector<16x16xbf16>
    %9 = arith.extf %8 : vector<16x16xbf16> to vector<16x16xf32>
    %cst_8 = arith.constant dense<0.000000e+00> : vector<16x128xf32>
    %10 = tpu.matmul %9, %6, %cst_8 {dimension_numbers = #tpu.dot_dimension_numbers<[0], [0], [1], [1], [0, 1, 1, 1], [], []>} : vector<16x16xf32>, vector<16x128xf32>, vector<16x128xf32> -> vector<16x128xf32>
    %c0_9 = arith.constant 0 : index
    %c0_10 = arith.constant 0 : index
    %11 = vector.load %arg8[%c0_9, %c0_10] : memref<16x128xf32, #tpu.memory_space<vmem>>, vector<16x128xf32>
    %12 = arith.addf %11, %10 : vector<16x128xf32>
    %c0_11 = arith.constant 0 : index
    %c0_12 = arith.constant 0 : index
    %13 = vector.load %arg8[%c0_11, %c0_12] : memref<16x128xf32, #tpu.memory_space<vmem>>, vector<16x128xf32>
    tpu.vector_store %arg8[%c0_11, %c0_12], %12 {strides = array<i32>} : memref<16x128xf32, #tpu.memory_space<vmem>>, vector<16x128xf32>,
    %c3_i32 = arith.constant 3 : i32
    %14 = arith.cmpi eq, %arg1, %c3_i32 : i32
    %15 = arith.extui %14 : i1 to i32
    %c0_i32_13 = arith.constant 0 : i32
    %16 = arith.cmpi ne, %15, %c0_i32_13 : i32
    scf.if %16 {
      %c0_14 = arith.constant 0 : index
      %c0_15 = arith.constant 0 : index
      %17 = vector.load %arg8[%c0_14, %c0_15] : memref<16x128xf32, #tpu.memory_space<vmem>>, vector<16x128xf32>
      %c0_16 = arith.constant 0 : index
      %c0_17 = arith.constant 0 : index
      %18 = vector.load %arg5[%c0_16, %c0_17] : memref<16x1xf32, #tpu.memory_space<vmem>>, vector<16x1xf32>
      %19 = vector.broadcast %18 : vector<16x1xf32> to vector<16x128xf32>
      %20 = arith.mulf %17, %19 : vector<16x128xf32>
      %c0_18 = arith.constant 0 : index
      %c0_19 = arith.constant 0 : index
      %21 = vector.load %arg6[%c0_18, %c0_19] : memref<1x128xf32, #tpu.memory_space<vmem>>, vector<1x128xf32>
      %22 = vector.broadcast %21 : vector<1x128xf32> to vector<16x128xf32>
      %23 = arith.addf %20, %22 : vector<16x128xf32>
      %c0_20 = arith.constant 0 : index
      %c0_21 = arith.constant 0 : index
      %24 = vector.load %arg7[%c0_20, %c0_21] : memref<16x128xf32, #tpu.memory_space<vmem>>, vector<16x128xf32>
      tpu.vector_store %arg7[%c0_20, %c0_21], %23 {strides = array<i32>} : memref<16x128xf32, #tpu.memory_space<vmem>>, vector<16x128xf32>,
    } else {
    }
    return
  }
  func.func @transform_0(%arg0: i32, %arg1: i32) -> (i32, i32) {
    %c0_i32 = arith.constant 0 : i32
    %c0_i32_0 = arith.constant 0 : i32
    %c0_i32_1 = arith.constant 0 : i32
    return %c0_i32, %c0_i32_0 : i32, i32
  }
  func.func @transform_1(%arg0: i32, %arg1: i32) -> (i32, i32, i32) {
    %c0_i32 = arith.constant 0 : i32
    %c0_i32_0 = arith.constant 0 : i32
    %c0_i32_1 = arith.constant 0 : i32
    return %arg1, %c0_i32, %c0_i32_0 : i32, i32, i32
  }
  func.func @transform_2(%arg0: i32, %arg1: i32) -> (i32, i32, i32) {
    %c0_i32 = arith.constant 0 : i32
    %c0_i32_0 = arith.constant 0 : i32
    return %arg1, %c0_i32, %arg0 : i32, i32, i32
  }
  func.func @transform_3(%arg0: i32, %arg1: i32) -> (i32, i32) {
    %c0_i32 = arith.constant 0 : i32
    %c0_i32_0 = arith.constant 0 : i32
    return %arg0, %c0_i32 : i32, i32
  }
  func.func @transform_4(%arg0: i32, %arg1: i32) -> (i32, i32) {
    %c0_i32 = arith.constant 0 : i32
    %c0_i32_0 = arith.constant 0 : i32
    %c0_i32_1 = arith.constant 0 : i32
    return %c0_i32, %c0_i32_0 : i32, i32
  }
  func.func @transform_5(%arg0: i32, %arg1: i32) -> (i32, i32) {
    %c0_i32 = arith.constant 0 : i32
    %c0_i32_0 = arith.constant 0 : i32
    return %arg0, %c0_i32 : i32, i32
  }
}

</mosaic_0001>

<bundles_post_ra>
// kernel: gcmc_layer_forward.2
= control target key start
LH: loop header
LB: loop body
LE: loop exit
PB: predicated region body
PF: predicated region fallthrough
CT: control target
= control target key end

     0   :  { %s1154_s0 = inlined_call_operand.vmem [shape: f32[16,16], index: 0, kind: input, shape index: {}]   ;;  %s1155_s1 = inlined_call_operand.hbm [shape: f32[4,16,128], index: 1, kind: input, shape index: {}]   ;;  %s1156_s2 = inlined_call_operand.vmem [shape: bf16[4,16,16], index: 2, kind: input, shape index: {}]   ;;  %s1157_s3 = inlined_call_operand.hbm [shape: f32[16,1], index: 3, kind: input, shape index: {}]   ;;  %s1158_s4 = inlined_call_operand.vmem [shape: f32[1,128], index: 4, kind: input, shape index: {}]   ;;  %s1159_s5 = inlined_call_operand.hbm [shape: f32[16,128], index: 5, kind: output, shape index: {}]  }
   0x1   :  { %1166 = sst [smem:[#allocation19_spill]] %s1155_s1 }
   0x2   :  { %10 = vsyncpa [#allocation4], 0 }
   0x3   :  { %12 = vsyncpa [#allocation4 + $0x1], 0 }
   0x4   :  { %13 = vsyncpa [#allocation7], 0 }
   0x5   :  { %15 = vsyncpa [#allocation7 + $0x1], 0 }
   0x6   :  { %16 = vsyncpa [#allocation5], 0 }
   0x7   :  { %18 = vsyncpa [#allocation5 + $0x1], 0  ;;  %s912_s18 = smov 0   ;;  %s914_s19 = smov 0  }
   0x8   :  { %s916_s20 = smov 0   ;;  %s918_s21 = smov 0  }
   0x9   :  { %s920_s22 = smov 0   ;;  %s922_s23 = smov 0  }
   0xa   :  { %s924_s24 = smov 0   ;;  %s926_s25 = smov 0  }
   0xb   :  { %s928_s26 = smov 0   ;;  %s930_s27 = smov 0  }
   0xc   :  { %s932_s28 = smov 0  }
   0xd LB: > { %1167 = sst [smem:[#allocation12_spill]] %s836_s18  ;;  %s33_s29 = sadd.s32 1, %s868_s26  ;;  %s876_s28 = sphi %s932_s28, %s24_s28   ;;  %s872_s27 = sphi %s930_s27, %s1189_s27   ;;  %s868_s26 = sphi %s928_s26, %s1188_s26   ;;  %s864_s25 = sphi %s926_s25, %s1187_s25   ;;  %s860_s24 = sphi %s924_s24, %s1186_s24   ;;  %s856_s23 = sphi %s922_s23, %s1185_s23   ;;  %s852_s22 = sphi %s920_s22, %s1194_s22   ;;  %s848_s21 = sphi %s918_s21, %s1193_s21   ;;  %s844_s20 = sphi %s916_s20, %s1192_s20   ;;  %s840_s19 = sphi %s914_s19, %s1191_s19   ;;  %s836_s18 = sphi %s912_s18, %s1190_s18  }
   0xe   : > { %1168 = sst [smem:[#allocation13_spill]] %s856_s23  ;;  %s64_s30 = sadd.s32 1, %s856_s23 }
   0xf   : > { %1169 = sst [smem:[#allocation14_spill]] %s868_s26  ;;  %p969_p0 = scmp.ge.s32.totalorder %s33_s29, 4 }
  0x10   : > { %1170 = sst [smem:[#allocation15_spill]] %s872_s27  ;;  %p71_p1 = scmp.ne.s32.totalorder %s856_s23, %s852_s22 }
  0x11   : > { %p72_p2 = scmp.eq.s32.totalorder %s876_s28, 0  ;;  %p77_p3 = scmp.ne.s32.totalorder %s852_s22, %s848_s21 }
  0x12   : > { %s1196_s29 = smov (%p969_p0, %s33_s29), 0  ;;  %p594_p5 = scmp.lt.s32.totalorder %s876_s28, 8 }
  0x13   : > { %1172 = sst [smem:[#allocation16_spill]] %s1196_s29  ;;  %p984_p4 = por %p72_p2, %p71_p1 }
  0x14   : > { %s61_s8 = ssub.s32 %s868_s26, %s1196_s29  ;;  %s208_s9 = sand.u32 1, %s856_s23  }
  0x15   : > { %p62_p6 = scmp.eq.s32.totalorder %s61_s8, 0  ;;  %s554_s10 = sshll.u32 %s208_s9, 4 }
  0x16   : > { %s574_s12 = sshll.u32 %s868_s26, 4  ;;  %s1175_s1 = sld [smem:[#allocation19_spill]] }
  0x17   : > { %s993_s11 = scalar_select %p62_p6, %s856_s23, %s64_s30  }
  0x18   : > { %s212_s16 = scalar_lea.vmem [#allocation3], %s554_s10  ;;  %p584_p7 = pnand %p594_p5, %p984_p4 }
  0x19   : > { %1174 = sst [smem:[#allocation17_spill]] %s993_s11  ;;  %s220_s17 = sshll.u32 %s212_s16, 4  ;;  %s221_s17 = int_to_ptr.vmem [resolvable:$true] %s220_s17 }
  0x1a   : > { %p559_p8 = scmp.ge.s32.totalorder %s876_s28, 1  ;;  %s209_s30 = scalar_lea.sflag [#allocation4], %s208_s9 }
  0x1b   : > { %s878_s8 = smov 128   ;;  %s879_s10 = smov 8  }
  0x1c   : > { %s217_s15 = scalar_lea.hbm %s1175_s1, %s574_s12  ;;  %p258_p9 = scmp.lt.s32.totalorder %s876_s28, 9 }
  0x1d   : > { %s218_s29 = sshll.u32 %s217_s15, 4  ;;  %s550_s13 = sadd.s32 4294967295, %s876_s28   ;;  %s219_s29 = int_to_ptr.hbm [resolvable:$true] %s218_s29 }
  0x1e   : > { %586 = dma.hbm_to_vmem [thread:$0]  (!%p584_p7), %s219_s29, 256, %s221_s17, %s209_s30, %s878_s8, %s878_s8, %s879_s10  }
  0x1f   : > { %p1005_p10 = pnand %p559_p8, %p258_p9  ;;  %s551_s7 = sadd.s32 4294967294, %s876_s28  }
  0x20   : > { %s36_s14 = sadd.s32 1, %s872_s27  ;;  %p78_p11 = scmp.eq.s32.totalorder %s550_s13, 0 }
  0x21   : > { %s1198_s14 = smov (!%p969_p0, %s36_s14), %s872_s27  ;;  %s118_s29 = sadd.s32 1, %s844_s20 }
  0x22   : > { %p1018_p12 = por %p78_p11, %p77_p3  ;;  %p38_p13 = scmp.ge.s32.totalorder %s1198_s14, 2 }
  0x23   : > { %p125_p1 = scmp.ne.s32.totalorder %s844_s20, %s840_s19  ;;  %p131_p4 = scmp.ne.s32.totalorder %s840_s19, %s836_s18 }
  0x24   : > { %p176_p6 = scmp.eq.s32.totalorder %s550_s13, 7  ;;  %s1200_s14 = smov (%p38_p13, %s1198_s14), 0 }
  0x25   : > { %1178 = sst [smem:[#allocation18_spill]] %s1200_s14  ;;  %p1031_p7 = por %p125_p1, %p72_p2 }
  0x26   : > { %p1035_p0 = por %p131_p4, %p78_p11  ;;  %s115_s6 = ssub.s32 %s872_s27, %s1200_s14 }
  0x27   : > { %p1041_p3 = por %p176_p6, %p125_p1  ;;  %p116_p8 = scmp.eq.s32.totalorder %s115_s6, 0 }
  0x28   : > { %p182_p9 = scmp.eq.s32.totalorder %s551_s7, 7  ;;  %s241_s17 = sand.u32 1, %s844_s20  }
  0x29   : > { %s558_s30 = sshll.u32 %s872_s27, 3  ;;  %s557_s13 = sshll.u32 %s241_s17, 3 }
  0x2a   : > { %s1048_s8 = scalar_select %p116_p8, %s844_s20, %s118_s29  }
  0x2b   : > { %p1050_p2 = por %p182_p9, %p131_p4  ;;  %s249_s11 = scalar_lea.hbm %s1157_s3, %s558_s30 }
  0x2c   : > { %s251_s14 = sshll.u32 %s249_s11, 4  ;;  %s245_s23 = scalar_lea.vmem [#allocation6], %s557_s13  ;;  %s252_s14 = int_to_ptr.hbm [resolvable:$true] %s251_s14 }
  0x2d   : > { %s253_s18 = sshll.u32 %s245_s23, 4  ;;  %p587_p11 = pnand %p594_p5, %p1031_p7  ;;  %s254_s18 = int_to_ptr.vmem [resolvable:$true] %s253_s18 }
  0x2e   : > { %s242_s7 = scalar_lea.sflag [#allocation7], %s241_s17  ;;  %262 = sbr.rel (%p1005_p10) target bundleno = 472 (0x1d8), region = 40 }
  0x2f   : > { %589 = dma.hbm_to_vmem [thread:$0]  (!%p587_p11), %s252_s14, 128, %s254_s18, %s242_s7  }
  0x30   : > { %s264_s29 = sand.u32 (!%p1005_p10), 1, %s852_s22  }
  0x31   : > { %s560_s6 = sshll.u32 (!%p1005_p10), %s264_s29, 4  ;;  %s265_s27 = scalar_lea.sflag (!%p1005_p10), [#allocation4], %s264_s29 }
  0x32   : > { %s268_s1 = scalar_lea.vmem (!%p1005_p10), [#allocation3], %s560_s6 }
  0x33   : > { %823 = dma.done.wait (%p1018_p12), %s265_s27, 256  }
  0x34   : > { %825 = vsyncadd (%p1018_p12), %s265_s27, 4294967040  ;;  %s1069_s23 = sand.u32 1, %s840_s19  }
  0x35   : > { %s561_s18 = sshll.u32 %s1069_s23, 3  ;;  %s275_s26 = scalar_lea.sflag [#allocation7], %s1069_s23 }
  0x36   : > { %s1073_s11 = scalar_lea.vmem [#allocation6], %s561_s18 }
  0x37   : > { %827 = dma.done.wait (%p1035_p0), %s275_s26, 128  }
  0x38   : > { %829 = vsyncadd (%p1035_p0), %s275_s26, 4294967168  ;;  %p319_p5 = scmp.lt.s32.totalorder %s860_s24, 3  ;;  %p321_p10 = scmp.lt.s32.totalorder %s864_s25, 1 }
  0x39   : > { %s1086_s7 = scalar_lea.vmem [#allocation8], %s561_s18  ;;  %p565_p12 = scmp.ne.s32.totalorder %s860_s24, 0 }
  0x3a   : > { %s320_s27 = scalar_select %p319_p5, %s860_s24, 3 }
  0x3b   : > { %s322_s12 = scalar_select %p321_p10, %s864_s25, 1 }
  0x3c   : > { %s563_s14 = sshll.u32 %s320_s27, 1  ;;  %330 = sbr.rel (%p565_p12) target bundleno = 67 (0x43), region = 52 }
  0x3d   : > { %s324_s9 = sadd.s32 %s563_s14, %s322_s12 }
  0x3e   : > { %s564_s15 = sshll.u32 %s324_s9, 2 }
  0x3f   : > { %s326_s13 = scalar_lea.vmem %s1156_s2, %s564_s15 }
  0x41   : > { %v880_v0 = vmov 0.0  }
  0x42   : > { %331 = vst [vmem:[#allocation2] sm:$0xff] %v880_v0 }
  0x43 PF: > { %v335_v1 = vld [vmem:[%s268_s1 + $0x8] sm:$0xff]  ;;  %v334_v2 = vld [vmem:[%s268_s1] sm:$0xff]  ;;  %vm336_vm0 = vcmask 130048   ;;  %p569_p13 = scmp.ne.s32.totalorder %s860_s24, 3 }
  0x44   : > { %575 = vmatpush.msra.mxu2 %v335_v1  ;;  %v333_v3 = vld [vmem:[%s1154_s0 + $0x8] sm:$0xff]  ;;  %357 = vmatpush.msra.mxu0 %v335_v1  ;;  %v332_v4 = vld [vmem:[%s1154_s0] sm:$0xff] }
  0x45   : > { %v366_v5 = vld [vmem:[%s326_s13] sm:$0xf] }
  0x46   : > { %576 = vmatpush.msra.mxu2 %v334_v2  ;;  %358 = vmatpush.msra.mxu0 %v334_v2  ;;  %v367_v8 = vunpack.c.l.bf16 %v366_v5 }
  0x47   : > { %567 = vmatmul.msk.f32.vlgmr.msra.gmra.mxu2 %vm336_vm0, %v333_v3  ;;  %566 = vmatmul.msk.f32.vlgmr.msra.gmra.mxu0 %vm336_vm0, %v332_v4 }
  0x49   : > { %v391_v9 = vld [vmem:[#allocation2] sm:$0xff] }
  0xc4   : > { %v360_v7 = vpop.f32.mrf.mxu0 }
  0xca   : > { %v363_v6 = vpop.f32.mrf.mxu2 }
  0xcb   : > { %385 = vmatpush.msra.mxu1 %v363_v6 }
  0xcd   : > { %386 = vmatpush.msra.mxu1 %v360_v7 }
  0xce   : > { %568 = vmatmul.msk.f32.vlgmr.msra.gmra.mxu1 %vm336_vm0, %v367_v8 }
 0x14a   : > { %397 = sbr.rel (%p569_p13) target bundleno = 457 (0x1c9), region = 56 }
 0x14b   : > { %v388_v10 = vpop.f32.mrf.mxu1 }
 0x14c   : > { %v392_v11 = vadd.f32 %v391_v9, %v388_v10 }
 0x14e   : > { %393 = vst [vmem:[#allocation2] sm:$0xff] %v392_v11 }
 0x14f   : > { %v399_v12 = vld [vmem:[%s1073_s11] sm:$0xff]  ;;  %v881_v13 = vmov 0   ;;  %v689_v15 = vld [vmem:[%s1158_s4] ss:$0 sm:$0xff] }
 0x150   : > { %688 = vset.pattern.permute.xlu0 %v881_v13 }
 0x151   : > { %402 = vperm.xlu0 %688, %v399_v12  }
 0x155   : > { %v398_v14 = vld [vmem:[#allocation2] sm:$0xff] }
 0x1c3   : > { %v403_v16 = vpop.permute.xlu0 %402 }
 0x1c4   : > { %v405_v17 = vmul.f32 %v403_v16, %v398_v14 }
 0x1c6   : > { %v410_v18 = vadd.f32 %v689_v15, %v405_v17 }
 0x1c8   : > { %411 = vst [vmem:[%s1086_s7] sm:$0xff] %v410_v18 }
 0x1c9 PF: > { %s571_s24 = sshll.u32 %s864_s25, 3  ;;  %s425_s14 = sshll.u32 %s1086_s7, 4  ;;  %s426_s14 = int_to_ptr.vmem [resolvable:$true] %s425_s14 }
 0x1ca   : > { %s423_s12 = scalar_lea.hbm %s1159_s5, %s571_s24  ;;  %s413_s15 = scalar_lea.sflag [#allocation5], %s1069_s23 }
 0x1cb   : > { %s427_s9 = sshll.u32 %s423_s12, 4  ;;  %s770_s25 = scalar_lea.hbm %s1159_s5, 16  ;;  %s428_s9 = int_to_ptr.hbm [resolvable:$true] %s427_s9 }
 0x1cc   : > { %s764_s17 = sshra.s32 %s428_s9, 4  ;;  %s765_s17 = int_to_ptr.hbm [resolvable:$true] %s764_s17 }
 0x1cd   : > { %s766_s30 = scalar_lea.hbm %s765_s17, 8  ;;  %p771_p7 = scmp.lt.s32.totalorder %s765_s17, %s1159_s5 }
 0x1ce   : > { %p767_p1 = scmp.ne.s32.totalorder %s765_s17, %s766_s30  ;;  %p772_p0 = scmp.lt.s32.totalorder %s770_s25, %s766_s30 }
 0x1d0   : > { %p768_p4 = pnand %p767_p1, %p1041_p3  ;;  %p773_p8 = por %p772_p0, %p771_p7 }
 0x1d2   : > { %p769_p6 = pneg %p768_p4 }
 0x1d4   : > { %p774_p9 = pnand %p773_p8, %p769_p6 }
 0x1d6   : > { %777 = shalt.err (!%p774_p9)
}
 0x1d7   : > { %581 = dma.vmem_to_hbm [thread:$0]  (%p1041_p3), %s426_s14, 128, %s428_s9, %s413_s15  }
 0x1d8 PF: > { %s1183_s23 = sld [smem:[#allocation12_spill]]  ;;  %p595_p11 = scmp.ge.s32.totalorder %s876_s28, 2 }
 0x1da   : > { %p591_p5 = pnand %p595_p11, %p1050_p2 }
 0x1dc   : > { %p592_p10 = pneg %p591_p5 }
 0x1de   : > { %s439_s7 = sand.u32 1, %s1183_s23  }
 0x1df   : > { %s440_s26 = scalar_lea.sflag [#allocation5], %s439_s7 }
 0x1e0   : > { %831 = dma.done.wait (%p592_p10), %s440_s26, 128  }
 0x1e1   : > { %833 = vsyncadd (%p592_p10), %s440_s26, 4294967168  ;;  %s24_s28 = sadd.s32 1, %s876_s28   ;;  %s1184_s16 = sld [smem:[#allocation13_spill]] }
 0x1e2   : > { %p21_p12 = scmp.ge.s32.totalorder %s24_s28, 10   ;;  %s1185_s23 = sld [smem:[#allocation17_spill]] }
 0x1e3   : > { %s1186_s24 = sld [smem:[#allocation14_spill]]  ;;  %s1190_s18 = smov %s840_s19 }
 0x1e4   : > { %s1187_s25 = sld [smem:[#allocation15_spill]]  ;;  %s1191_s19 = smov %s844_s20 }
 0x1e5   : > { %s1188_s26 = sld [smem:[#allocation16_spill]]  ;;  %s1192_s20 = smov %s1048_s8 }
 0x1e6   : > { %s1189_s27 = sld [smem:[#allocation18_spill]]  ;;  %s1193_s21 = smov %s852_s22 }
 0x1e7   : > { %s1194_s22 = smov %s1184_s16  ;;  %23 = sbr.rel (!%p21_p12) target bundleno = 13 (0xd), region = 109 }
 0x1ec   :  { %446 = vsyncpa [#allocation4], 1 }
 0x1ed   :  { %448 = vsyncpa [#allocation4 + $0x1], 1 }
 0x1ee   :  { %449 = vsyncpa [#allocation7], 1 }
 0x1ef   :  { %451 = vsyncpa [#allocation7 + $0x1], 1 }
 0x1f0   :  { %452 = vsyncpa [#allocation5], 1 }
 0x1f1   :  { %454 = vsyncpa [#allocation5 + $0x1], 1 }

// kernel: gcmc_layer_forward.3
= control target key start
LH: loop header
LB: loop body
LE: loop exit
PB: predicated region body
PF: predicated region fallthrough
CT: control target
= control target key end

     0   :  { %10 = vsyncpa [#allocation4], 0  ;;  %s678_s18 = smov 0   ;;  %s680_s19 = smov 0   ;;  %s738_s0 = inlined_call_operand.vmem [shape: f32[16,24], index: 0, kind: input, shape index: {}]   ;;  %s739_s1 = inlined_call_operand.vmem [shape: f32[4,24,128], index: 1, kind: input, shape index: {}]   ;;  %s740_s2 = inlined_call_operand.vmem [shape: bf16[4,16,16], index: 2, kind: input, shape index: {}]   ;;  %s741_s3 = inlined_call_operand.vmem [shape: f32[16,1], index: 3, kind: input, shape index: {}]   ;;  %s742_s4 = inlined_call_operand.vmem [shape: f32[1,128], index: 4, kind: input, shape index: {}]   ;;  %s743_s5 = inlined_call_operand.hbm [shape: f32[16,128], index: 5, kind: output, shape index: {}]  }
   0x1   :  { %s682_s20 = smov 0  }
   0x2 LB: > { %s520_s21 = sadd.s32 4294967295, %s641_s20   ;;  %s25_s22 = sadd.s32 1, %s637_s19  ;;  %s641_s20 = sphi %s682_s20, %s16_s20   ;;  %s637_s19 = sphi %s680_s19, %s745_s19   ;;  %s633_s18 = sphi %s678_s18, %s744_s18  }
   0x3   : > { %p26_p0 = scmp.ge.s32.totalorder %s25_s22, 4  ;;  %p524_p1 = scmp.ge.s32.totalorder %s641_s20, 1 }
   0x4   : > { %p226_p2 = scmp.lt.s32.totalorder %s641_s20, 5 }
   0x5   : > { %s747_s22 = smov (%p26_p0, %s25_s22), 0 }
   0x6   : > { %p227_p3 = pnand %p524_p1, %p226_p2 }
   0x7   : > { %p262_p4 = scmp.lt.s32.totalorder (!%p227_p3), %s633_s18, 3  ;;  %p528_p5 = scmp.ne.s32.totalorder (!%p227_p3), %s633_s18, 0 }
   0x8   : > { %230 = sbr.rel (%p227_p3) target bundleno = 469 (0x1d5), region = 40 }
   0xd   : > { %s263_s23 = scalar_select %p262_p4, %s633_s18, 3 }
   0xe   : > { %285 = sbr.rel (%p528_p5) target bundleno = 22 (0x16), region = 44 }
   0xf   : > { %s548_s24 = smul.u32 24, %s263_s23  ;;  %s538_s25 = sshll.u32 %s263_s23, 3 }
  0x10   : > { %s274_s28 = scalar_lea.vmem %s740_s2, %s538_s25 }
  0x11   : > { %s266_s6 = scalar_lea.vmem %s739_s1, %s548_s24 }
  0x13   : > { %v643_v0 = vmov 0.0  }
  0x14   : > { %286 = vst [vmem:[#allocation2] sm:$0xff] %v643_v0 }
  0x15   : > { %287 = vst [vmem:[#allocation2 + $0x8] sm:$0xff] %v643_v0 }
  0x16 PF: > { %v540_v1 = vld [vmem:[%s274_s28] sm:$0xff]   ;;  %v292_v2 = vld [vmem:[%s266_s6 + $0x10] sm:$0xff]  ;;  %v291_v3 = vld [vmem:[%s266_s6 + $0x8] sm:$0xff]  ;;  %vm293_vm0 = vcmask 195584   ;;  %vm359_vm1 = vcmask 130048   ;;  %p533_p6 = scmp.ne.s32.totalorder %s633_s18, 3 }
  0x17   : > { %v541_v4 = vunpack.c.l.bf16 %v540_v1  ;;  %543 = vmatpush.msra.mxu2 %v292_v2  ;;  %313 = vmatpush.msra.mxu0 %v292_v2  ;;  %v290_v5 = vld [vmem:[%s266_s6] sm:$0xff]  ;;  %v289_v6 = vld [vmem:[%s738_s0 + $0x8] sm:$0xff]  ;;  %v542_v8 = vunpack.c.h.bf16 %v540_v1 }
  0x18   : > { %v288_v7 = vld [vmem:[%s738_s0] sm:$0xff] }
  0x19   : > { %327 = vxpose.xlu0.b32.start [1/2] (short) (narrow) %v541_v4, 16  ;;  %544 = vmatpush.msra.mxu2 %v291_v3 }
  0x1a   : > { %314 = vmatpush.msra.mxu0 %v291_v3 }
  0x1b   : > { %545 = vmatpush.msra.mxu2 %v290_v5  ;;  %v389_v13 = vld [vmem:[#allocation2] sm:$0xff] }
  0x1c   : > { %530 = vmatmul.msk.f32.vlgmr.msra.gmra.mxu2 %vm293_vm0, %v289_v6  ;;  %315 = vmatpush.msra.mxu0 %v290_v5  ;;  %v390_v16 = vld [vmem:[#allocation2 + $0x8] sm:$0xff] }
  0x1d   : > { %529 = vmatmul.msk.f32.vlgmr.msra.gmra.mxu0 %vm293_vm0, %v288_v7 }
  0x21   : > { %328 = vxpose.xlu0.b32.end [2/2] (short) (narrow) %v542_v8, 16 }
  0x9a   : > { %v317_v10 = vpop.f32.mrf.mxu0 }
  0x9f   : > { %v320_v9 = vpop.f32.mrf.mxu2 }
  0xa0   : > { %380 = vmatpush.msra.mxu1 %v320_v9  ;;  %546 = vmatpush.msra.mxu3 %v320_v9 }
  0xa2   : > { %381 = vmatpush.msra.mxu1 %v317_v10  ;;  %547 = vmatpush.msra.mxu3 %v317_v10 }
  0xbd   : > { %v343_v11 = vpop.trf.xlu0 }
  0xbe   : > { %531 = vmatmul.msk.f32.vlgmr.msra.gmra.mxu1 %vm359_vm1, %v343_v11 }
  0xc5   : > { %v344_v12 = vpop.trf.xlu0 }
  0xc6   : > { %532 = vmatmul.msk.f32.vlgmr.msra.gmra.mxu3 %vm359_vm1, %v344_v12 }
 0x13b   : > { %v383_v14 = vpop.f32.mrf.mxu1 }
 0x13c   : > { %v391_v15 = vadd.f32 %v389_v13, %v383_v14 }
 0x13e   : > { %393 = vst [vmem:[#allocation2] sm:$0xff] %v391_v15 }
 0x148   : > { %398 = sbr.rel (%p533_p6) target bundleno = 463 (0x1cf), region = 48 }
 0x149   : > { %v386_v17 = vpop.f32.mrf.mxu3 }
 0x14a   : > { %v392_v18 = vadd.f32 %v390_v16, %v386_v17 }
 0x14c   : > { %394 = vst [vmem:[#allocation2 + $0x8] sm:$0xff] %v392_v18 }
 0x14d   : > { %v401_v19 = vld [vmem:[%s741_s3] sm:$0xff]  ;;  %v644_v20 = vmov 0   ;;  %v402_v21 = vld [vmem:[%s741_s3 + $0x8] sm:$0xff] }
 0x14e   : > { %585 = vset.pattern.permute.xlu0 %v644_v20  ;;  %v399_v22 = vld [vmem:[#allocation2] sm:$0xff] }
 0x14f   : > { %405 = vperm.xlu0 %585, %v401_v19   ;;  %v586_v23 = vld [vmem:[%s742_s4] ss:$0 sm:$0xff] }
 0x153   : > { %v400_v27 = vld [vmem:[#allocation2 + $0x8] sm:$0xff] }
 0x157   : > { %410 = vperm.xlu0 %585, %v402_v21  }
 0x1c1   : > { %v406_v24 = vpop.permute.xlu0 %405 }
 0x1c2   : > { %v413_v25 = vmul.f32 %v406_v24, %v399_v22 }
 0x1c4   : > { %v419_v26 = vadd.f32 %v586_v23, %v413_v25 }
 0x1c6   : > { %421 = vst [vmem:[#allocation3] sm:$0xff] %v419_v26 }
 0x1c9   : > { %v411_v28 = vpop.permute.xlu0 %410 }
 0x1ca   : > { %v414_v29 = vmul.f32 %v411_v28, %v400_v27 }
 0x1cc   : > { %v420_v30 = vadd.f32 %v586_v23, %v414_v29 }
 0x1ce   : > { %422 = vst [vmem:[#allocation3 + $0x8] sm:$0xff] %v420_v30 }
 0x1cf PF: > { %p553_p7 = scmp.eq.s32.totalorder %s520_s21, 3  ;;  %s433_s23 = sshll.u32 %s743_s5, 4  ;;  %s434_s23 = int_to_ptr.hbm [resolvable:$true] %s433_s23 }
 0x1d0   : > { %s645_s24 = smov [#allocation3]   ;;  %s646_s26 = smov 128  }
 0x1d1   : > { %s431_s25 = sshll.u32 %s645_s24, 4  ;;  %s647_s27 = smov 8   ;;  %s432_s25 = int_to_ptr.vmem [resolvable:$true] %s431_s25 }
 0x1d2   : > { %550 = dma.vmem_to_hbm [thread:$0]  (%p553_p7), %s432_s25, 256, %s434_s23, [#allocation4], %s646_s26, %s646_s26, %s647_s27  }
 0x1d3   : > { %628 = dma.done.wait (%p553_p7), [#allocation4], 256  }
 0x1d4   : > { %630 = vsyncadd (%p553_p7), [#allocation4], 4294967040 }
 0x1d5 PF: > { %s16_s20 = sadd.s32 1, %s641_s20   ;;  %s744_s18 = smov %s637_s19 }
 0x1d6   : > { %p13_p8 = scmp.ge.s32.totalorder %s16_s20, 6   ;;  %s745_s19 = smov %s747_s22 }
 0x1d8   :  { %15 = sbr.rel (!%p13_p8) target bundleno = 2 (0x2), region = 82 }
 0x1dd   :  { %450 = vsyncpa [#allocation4], 1 }
 0x1de   :  { %452 = vsyncpa [#allocation4 + $0x1], 1 }

</bundles_post_ra>
